<compile_context>
chip_gen: v7x
topology: tpu7x:2x2x1
jax: 0.10.0
libtpu: 0.0.40
codegen_flags: <defaults>
</compile_context>

<pallas_src>
import jax
import jax.numpy as jnp
from jax.experimental import pallas as pl
from jax.experimental.pallas import tpu as pltpu


def _prob_hypernet_kernel(xa_ref, e_ref,
                          wxh_ref, bxh_ref,
                          whead_ref, bhead_ref,
                          M_ref, m2row_ref,
                          h_out_ref, kl_ref):
    r, c = M_ref.shape
    x_aug = xa_ref[...]                                                      # (TM, r)

    # --- hypernet MLP: one trunk matmul + ONE fused head matmul -------------------
    h = jnp.dot(x_aug, wxh_ref[...], preferred_element_type=jnp.float32) + bxh_ref[...]
    h = jnp.maximum(h, 0.0)                                                  # (TM, h_dim)
    head = (jnp.dot(h, whead_ref[...], preferred_element_type=jnp.float32)
            + bhead_ref[...])                                                # (TM, 2r+c)
    # head columns: [ mu (r) | logvar_r (r) | logvar_c (c) ]
    mu = head[:, :r]                                                         # (TM, r)
    lv = head[:, r:]                                                         # (TM, r+c)

    # one EUP exp for both logvar blocks; var = sd*sd is a free VPU multiply
    sd = jnp.exp(0.5 * lv)                                                   # (TM, r+c)
    var = sd * sd
    sd_r, sd_c = sd[:, :r], sd[:, r:]

    # --- h_out = x_aug @ W with W = mu*M + sd_r*E*sd_c, split into two terms ------
    # term1: sum_i x_i * mu_i * M_ij  -> MXU matmul
    term1 = jnp.dot(x_aug * mu, M_ref[...], preferred_element_type=jnp.float32)  # (TM, c)
    # term2: sd_c_j * sum_i (x_i*sd_r_i) * E_ij  -> statically unrolled FMA over r
    u = x_aug * sd_r                                                         # (TM, r)
    acc = u[:, 0:1] * e_ref[0]                                               # (TM, c)
    for i in range(1, r):                                                    # r is small & static
        acc = acc + u[:, i:i + 1] * e_ref[i]
    h_out_ref[...] = term1 + acc * sd_c

    # --- per-sample KL (mean taken in the wrapper) --------------------------------
    sum_vr = jnp.sum(var[:, :r], axis=1, keepdims=True)                      # (TM, 1)
    sum_vc = jnp.sum(var[:, r:], axis=1, keepdims=True)
    sum_lr = jnp.sum(lv[:, :r], axis=1, keepdims=True)
    sum_lc = jnp.sum(lv[:, r:], axis=1, keepdims=True)
    # ||mu*M||_F^2 per sample = sum_i mu_i^2 * (sum_j M_ij^2): VPU mul + lane reduce
    norm_m2 = jnp.sum((mu * mu) * m2row_ref[...], axis=1, keepdims=True)     # (TM, 1)
    kl_ref[...] = 0.5 * (sum_vr * sum_vc + norm_m2
                         - float(r * c) - float(c) * sum_lr - float(r) * sum_lc)


def _pick_batch_tile(m, cap=256):
    """Largest multiple of 8 that divides m and is <= cap (fallback: the full batch).

    cap=256 keeps the (padded) double-buffered E tile a few MiB, safely inside the
    scoped-VMEM defaults on v5e (16 MiB), v6e (32 MiB) and v7x (32 of 64 MiB), while
    feeding >=256 LHS rows per MXU pass on v6e when the batch is large enough."""
    if m % 8 != 0:
        return m
    tm = min(m, cap) - (min(m, cap) % 8)
    while m % tm != 0:
        tm -= 8
    return tm


def prob_hypernet_forward(x, params, E, tm=None):
    """x: (m, in_dim) f32, E: (m, in_dim+1, out_dim) f32 standard-normal noise."""
    m, in_dim = x.shape
    r, c = params["M"].shape
    h_dim = params["W_xh"].shape[1]
    assert r == in_dim + 1 and E.shape == (m, r, c)
    f32 = jnp.float32

    # glue / parameter folding (pure layout work, done once per call) --------------
    x_aug = jnp.concatenate([x, jnp.ones((m, 1), x.dtype)], axis=1)          # (m, r)
    w_xh = jnp.concatenate([params["W_xh"],
                            jnp.zeros((1, h_dim), f32)], axis=0)             # (r, h_dim)
    w_head = jnp.concatenate([params["W_hmu"], params["W_hlv_in"],
                              params["W_hlv_out"]], axis=1)                  # (h_dim, 2r+c)
    b_head = jnp.concatenate([params["b_hmu"], params["b_hlv_in"],
                              params["b_hlv_out"]], axis=1)                  # (1, 2r+c)
    m_row_sq = jnp.sum(params["M"] * params["M"], axis=1)[None, :]           # (1, r)
    # Present E with r leading so each kernel step loads a dense (TM, c) slab.
    # TODO(synk): in production generate E directly in (r, m, c) layout (or in-kernel
    # via pltpu.prng_*) so this transpose never touches HBM.
    e_t = jnp.transpose(E, (1, 0, 2))                                        # (r, m, c)

    tm = _pick_batch_tile(m) if tm is None else tm
    assert m % tm == 0 and (tm % 8 == 0 or tm == m)
    grid = (m // tm,)
    hw = 2 * r + c

    def const(shape):  # full-array block, resident across the batch grid
        return pl.BlockSpec(shape, lambda i: (0,) * len(shape))

    in_specs = [
        pl.BlockSpec((tm, r), lambda i: (i, 0)),          # x_aug
        pl.BlockSpec((r, tm, c), lambda i: (0, i, 0)),    # E (r leading)
        const((r, h_dim)), const((1, h_dim)),             # trunk weight / bias
        const((h_dim, hw)), const((1, hw)),               # fused head weight / bias
        const((r, c)), const((1, r)),                     # M, row norms of M^2
    ]
    out_specs = (
        pl.BlockSpec((tm, c), lambda i: (i, 0)),          # h_out
        pl.BlockSpec((tm, 1), lambda i: (i, 0)),          # per-sample KL partials
    )

    flops = 2 * m * (r * h_dim + h_dim * hw + 2 * r * c) + 10 * m * (r + c)
    bytes_accessed = 4 * (m * r + m * r * c + r * h_dim + h_dim * hw
                          + h_dim + hw + r * c + r + m * c + m)
    cost = pl.CostEstimate(flops=flops, transcendentals=m * (r + c),
                           bytes_accessed=bytes_accessed)

    h_out, kl = pl.pallas_call(
        _prob_hypernet_kernel,
        out_shape=(jax.ShapeDtypeStruct((m, c), f32),
                   jax.ShapeDtypeStruct((m, 1), f32)),
        grid=grid,
        in_specs=in_specs,
        out_specs=out_specs,
        compiler_params=pltpu.CompilerParams(dimension_semantics=("parallel",)),
        cost_estimate=cost,
    )(x_aug, e_t, w_xh, params["b_xh"], w_head, b_head, params["M"], m_row_sq)

    return h_out, jnp.mean(kl)


def init_params(key, in_dim, out_dim, h_dim):
    """Deterministic synthetic init mirroring the shapes of ProbHypernet.__init__."""
    r = in_dim + 1
    ks = jax.random.split(key, 9)

    def linear(kw, kb, fan_in, fan_out):
        bound = 1.0 / jnp.sqrt(float(fan_in))
        w = jax.random.uniform(kw, (fan_in, fan_out), jnp.float32, -bound, bound)
        b = jax.random.uniform(kb, (1, fan_out), jnp.float32, -bound, bound)
        return w, b

    W_xh, b_xh = linear(ks[0], ks[1], in_dim, h_dim)
    W_hmu, b_hmu = linear(ks[2], ks[3], h_dim, r)
    W_hlv_in, b_hlv_in = linear(ks[4], ks[5], h_dim, r)
    W_hlv_out, b_hlv_out = linear(ks[6], ks[7], h_dim, out_dim)
    M = jax.random.uniform(ks[8], (r, out_dim), jnp.float32, -0.0001, 0.0001)
    return dict(W_xh=W_xh, b_xh=b_xh, W_hmu=W_hmu, b_hmu=b_hmu,
                W_hlv_in=W_hlv_in, b_hlv_in=b_hlv_in,
                W_hlv_out=W_hlv_out, b_hlv_out=b_hlv_out, M=M)


def reference_forward(x, params, E):
    """Pure-JAX reference reproducing the PyTorch forward exactly."""
    m, in_dim = x.shape
    r, c = params["M"].shape
    h = jax.nn.relu(x @ params["W_xh"] + params["b_xh"])
    mu = h @ params["W_hmu"] + params["b_hmu"]
    lv_r = h @ params["W_hlv_in"] + params["b_hlv_in"]
    lv_c = h @ params["W_hlv_out"] + params["b_hlv_out"]
    var_r, var_c = jnp.exp(lv_r), jnp.exp(lv_c)
    M_s = mu[:, :, None] * params["M"][None, :, :]
    W = M_s + jnp.sqrt(var_r)[:, :, None] * E * jnp.sqrt(var_c)[:, None, :]
    x_aug = jnp.concatenate([x, jnp.ones((m, 1), x.dtype)], axis=1)
    h_out = jnp.einsum("bi,bij->bj", x_aug, W)
    kl = 0.5 * (jnp.sum(var_r, 1) * jnp.sum(var_c, 1)
                + jnp.sum(M_s.reshape(m, -1) ** 2, 1)
                - r * c - c * jnp.sum(lv_r, 1) - r * jnp.sum(lv_c, 1))
    return h_out, jnp.mean(kl)


if __name__ == "__main__":
    in_dim, out_dim, h_dim, m = 16, 32, 32, 16
    r = in_dim + 1

    key = jax.random.PRNGKey(0)
    k_param, k_x, k_e = jax.random.split(key, 3)

    params = init_params(k_param, in_dim, out_dim, h_dim)
    x = jax.random.normal(k_x, (m, in_dim), jnp.float32)
    E = jax.random.normal(k_e, (m, r, out_dim), jnp.float32)   # torch.randn(m, r, c)

    # tm=8 -> 2 batch tiles, exercising the grid, resident weights and partial-KL path.
    h_out, d_kl = prob_hypernet_forward(x, params, E, tm=8)
    h_out = jax.block_until_ready(h_out)
    d_kl = jax.block_until_ready(d_kl)

    h_ref, kl_ref = reference_forward(x, params, E)
    assert h_out.shape == (m, out_dim) and d_kl.shape == ()
    assert jnp.allclose(h_out, h_ref, atol=1e-4, rtol=1e-4)
    assert jnp.allclose(d_kl, kl_ref, atol=1e-4, rtol=1e-4)

    print("KERNEL_OK")
</pallas_src>

<mosaic_0001>
module attributes {stable_mosaic.version = 11 : i64} {
  func.func @_prob_hypernet_kernel(%arg0: i32, %arg1: memref<8x17xf32, #tpu.memory_space<vmem>>, %arg2: memref<17x8x32xf32, #tpu.memory_space<vmem>>, %arg3: memref<17x32xf32, #tpu.memory_space<vmem>>, %arg4: memref<1x32xf32, #tpu.memory_space<vmem>>, %arg5: memref<32x66xf32, #tpu.memory_space<vmem>>, %arg6: memref<1x66xf32, #tpu.memory_space<vmem>>, %arg7: memref<17x32xf32, #tpu.memory_space<vmem>>, %arg8: memref<1x17xf32, #tpu.memory_space<vmem>>, %arg9: memref<8x32xf32, #tpu.memory_space<vmem>>, %arg10: memref<8x1xf32, #tpu.memory_space<vmem>>) attributes {dimension_semantics = [#tpu.dimension_semantics<parallel>], iteration_bounds = array<i64: 2>, scalar_prefetch = 0 : i64, scratch_operands = 0 : i64, tpu.core_type = #tpu.core_type<tc>, window_params = [{transform_indices = @transform_0, window_bounds = array<i64: 8, 17>}, {transform_indices = @transform_1, window_bounds = array<i64: 17, 8, 32>}, {pipeline_mode = #tpu.pipeline_mode<synchronous>, transform_indices = @transform_2, window_bounds = array<i64: 17, 32>}, {pipeline_mode = #tpu.pipeline_mode<synchronous>, transform_indices = @transform_3, window_bounds = array<i64: 1, 32>}, {pipeline_mode = #tpu.pipeline_mode<synchronous>, transform_indices = @transform_4, window_bounds = array<i64: 32, 66>}, {pipeline_mode = #tpu.pipeline_mode<synchronous>, transform_indices = @transform_5, window_bounds = array<i64: 1, 66>}, {pipeline_mode = #tpu.pipeline_mode<synchronous>, transform_indices = @transform_6, window_bounds = array<i64: 17, 32>}, {pipeline_mode = #tpu.pipeline_mode<synchronous>, transform_indices = @transform_7, window_bounds = array<i64: 1, 17>}, {transform_indices = @transform_8, window_bounds = array<i64: 8, 32>}, {transform_indices = @transform_9, window_bounds = array<i64: 8, 1>}]} {
    %c0 = arith.constant 0 : index
    %c0_0 = arith.constant 0 : index
    %0 = vector.load %arg1[%c0, %c0_0] : memref<8x17xf32, #tpu.memory_space<vmem>>, vector<8x17xf32>
    %c0_1 = arith.constant 0 : index
    %c0_2 = arith.constant 0 : index
    %1 = vector.load %arg3[%c0_1, %c0_2] : memref<17x32xf32, #tpu.memory_space<vmem>>, vector<17x32xf32>
    %cst = arith.constant dense<0.000000e+00> : vector<8x32xf32>
    %2 = tpu.matmul %0, %1, %cst {dimension_numbers = #tpu.dot_dimension_numbers<[1], [0], [0], [1], [0, 0, 1, 1], [], []>} : vector<8x17xf32>, vector<17x32xf32>, vector<8x32xf32> -> vector<8x32xf32>
    %c0_3 = arith.constant 0 : index
    %c0_4 = arith.constant 0 : index
    %3 = vector.load %arg4[%c0_3, %c0_4] : memref<1x32xf32, #tpu.memory_space<vmem>>, vector<1x32xf32>
    %4 = vector.broadcast %3 : vector<1x32xf32> to vector<8x32xf32>
    %5 = arith.addf %2, %4 : vector<8x32xf32>
    %cst_5 = arith.constant 0.000000e+00 : f32
    %6 = vector.broadcast %cst_5 : f32 to vector<8x32xf32>
    %7 = arith.maximumf %5, %6 : vector<8x32xf32>
    %c0_6 = arith.constant 0 : index
    %c0_7 = arith.constant 0 : index
    %8 = vector.load %arg5[%c0_6, %c0_7] : memref<32x66xf32, #tpu.memory_space<vmem>>, vector<32x66xf32>
    %cst_8 = arith.constant dense<0.000000e+00> : vector<8x66xf32>
    %9 = tpu.matmul %7, %8, %cst_8 {dimension_numbers = #tpu.dot_dimension_numbers<[1], [0], [0], [1], [0, 0, 1, 1], [], []>} : vector<8x32xf32>, vector<32x66xf32>, vector<8x66xf32> -> vector<8x66xf32>
    %c0_9 = arith.constant 0 : index
    %c0_10 = arith.constant 0 : index
    %10 = vector.load %arg6[%c0_9, %c0_10] : memref<1x66xf32, #tpu.memory_space<vmem>>, vector<1x66xf32>
    %11 = vector.broadcast %10 : vector<1x66xf32> to vector<8x66xf32>
    %12 = arith.addf %9, %11 : vector<8x66xf32>
    %13 = vector.extract_strided_slice %12 {offsets = [0, 0], sizes = [8, 17], strides = [1, 1]} : vector<8x66xf32> to vector<8x17xf32>
    %14 = vector.extract_strided_slice %12 {offsets = [0, 17], sizes = [8, 49], strides = [1, 1]} : vector<8x66xf32> to vector<8x49xf32>
    %cst_11 = arith.constant 5.000000e-01 : f32
    %15 = vector.broadcast %cst_11 : f32 to vector<8x49xf32>
    %16 = arith.mulf %15, %14 : vector<8x49xf32>
    %17 = math.exp %16 : vector<8x49xf32>
    %18 = arith.mulf %17, %17 : vector<8x49xf32>
    %19 = vector.extract_strided_slice %17 {offsets = [0, 0], sizes = [8, 17], strides = [1, 1]} : vector<8x49xf32> to vector<8x17xf32>
    %20 = vector.extract_strided_slice %17 {offsets = [0, 17], sizes = [8, 32], strides = [1, 1]} : vector<8x49xf32> to vector<8x32xf32>
    %21 = arith.mulf %0, %13 : vector<8x17xf32>
    %c0_12 = arith.constant 0 : index
    %c0_13 = arith.constant 0 : index
    %22 = vector.load %arg7[%c0_12, %c0_13] : memref<17x32xf32, #tpu.memory_space<vmem>>, vector<17x32xf32>
    %cst_14 = arith.constant dense<0.000000e+00> : vector<8x32xf32>
    %23 = tpu.matmul %21, %22, %cst_14 {dimension_numbers = #tpu.dot_dimension_numbers<[1], [0], [0], [1], [0, 0, 1, 1], [], []>} : vector<8x17xf32>, vector<17x32xf32>, vector<8x32xf32> -> vector<8x32xf32>
    %24 = arith.mulf %0, %19 : vector<8x17xf32>
    %25 = vector.extract_strided_slice %24 {offsets = [0, 0], sizes = [8, 1], strides = [1, 1]} : vector<8x17xf32> to vector<8x1xf32>
    %c0_15 = arith.constant 0 : index
    %c0_16 = arith.constant 0 : index
    %c0_17 = arith.constant 0 : index
    %26 = vector.load %arg2[%c0_15, %c0_16, %c0_17] : memref<17x8x32xf32, #tpu.memory_space<vmem>>, vector<1x8x32xf32>
    %27 = vector.shape_cast %26 : vector<1x8x32xf32> to vector<8x32xf32>
    %28 = vector.broadcast %25 : vector<8x1xf32> to vector<8x32xf32>
    %29 = arith.mulf %28, %27 : vector<8x32xf32>
    %30 = vector.extract_strided_slice %24 {offsets = [0, 1], sizes = [8, 1], strides = [1, 1]} : vector<8x17xf32> to vector<8x1xf32>
    %c1 = arith.constant 1 : index
    %c0_18 = arith.constant 0 : index
    %c0_19 = arith.constant 0 : index
    %31 = vector.load %arg2[%c1, %c0_18, %c0_19] : memref<17x8x32xf32, #tpu.memory_space<vmem>>, vector<1x8x32xf32>
    %32 = vector.shape_cast %31 : vector<1x8x32xf32> to vector<8x32xf32>
    %33 = vector.broadcast %30 : vector<8x1xf32> to vector<8x32xf32>
    %34 = arith.mulf %33, %32 : vector<8x32xf32>
    %35 = arith.addf %29, %34 : vector<8x32xf32>
    %36 = vector.extract_strided_slice %24 {offsets = [0, 2], sizes = [8, 1], strides = [1, 1]} : vector<8x17xf32> to vector<8x1xf32>
    %c2 = arith.constant 2 : index
    %c0_20 = arith.constant 0 : index
    %c0_21 = arith.constant 0 : index
    %37 = vector.load %arg2[%c2, %c0_20, %c0_21] : memref<17x8x32xf32, #tpu.memory_space<vmem>>, vector<1x8x32xf32>
    %38 = vector.shape_cast %37 : vector<1x8x32xf32> to vector<8x32xf32>
    %39 = vector.broadcast %36 : vector<8x1xf32> to vector<8x32xf32>
    %40 = arith.mulf %39, %38 : vector<8x32xf32>
    %41 = arith.addf %35, %40 : vector<8x32xf32>
    %42 = vector.extract_strided_slice %24 {offsets = [0, 3], sizes = [8, 1], strides = [1, 1]} : vector<8x17xf32> to vector<8x1xf32>
    %c3 = arith.constant 3 : index
    %c0_22 = arith.constant 0 : index
    %c0_23 = arith.constant 0 : index
    %43 = vector.load %arg2[%c3, %c0_22, %c0_23] : memref<17x8x32xf32, #tpu.memory_space<vmem>>, vector<1x8x32xf32>
    %44 = vector.shape_cast %43 : vector<1x8x32xf32> to vector<8x32xf32>
    %45 = vector.broadcast %42 : vector<8x1xf32> to vector<8x32xf32>
    %46 = arith.mulf %45, %44 : vector<8x32xf32>
    %47 = arith.addf %41, %46 : vector<8x32xf32>
    %48 = vector.extract_strided_slice %24 {offsets = [0, 4], sizes = [8, 1], strides = [1, 1]} : vector<8x17xf32> to vector<8x1xf32>
    %c4 = arith.constant 4 : index
    %c0_24 = arith.constant 0 : index
    %c0_25 = arith.constant 0 : index
    %49 = vector.load %arg2[%c4, %c0_24, %c0_25] : memref<17x8x32xf32, #tpu.memory_space<vmem>>, vector<1x8x32xf32>
    %50 = vector.shape_cast %49 : vector<1x8x32xf32> to vector<8x32xf32>
    %51 = vector.broadcast %48 : vector<8x1xf32> to vector<8x32xf32>
    %52 = arith.mulf %51, %50 : vector<8x32xf32>
    %53 = arith.addf %47, %52 : vector<8x32xf32>
    %54 = vector.extract_strided_slice %24 {offsets = [0, 5], sizes = [8, 1], strides = [1, 1]} : vector<8x17xf32> to vector<8x1xf32>
    %c5 = arith.constant 5 : index
    %c0_26 = arith.constant 0 : index
    %c0_27 = arith.constant 0 : index
    %55 = vector.load %arg2[%c5, %c0_26, %c0_27] : memref<17x8x32xf32, #tpu.memory_space<vmem>>, vector<1x8x32xf32>
    %56 = vector.shape_cast %55 : vector<1x8x32xf32> to vector<8x32xf32>
    %57 = vector.broadcast %54 : vector<8x1xf32> to vector<8x32xf32>
    %58 = arith.mulf %57, %56 : vector<8x32xf32>
    %59 = arith.addf %53, %58 : vector<8x32xf32>
    %60 = vector.extract_strided_slice %24 {offsets = [0, 6], sizes = [8, 1], strides = [1, 1]} : vector<8x17xf32> to vector<8x1xf32>
    %c6 = arith.constant 6 : index
    %c0_28 = arith.constant 0 : index
    %c0_29 = arith.constant 0 : index
    %61 = vector.load %arg2[%c6, %c0_28, %c0_29] : memref<17x8x32xf32, #tpu.memory_space<vmem>>, vector<1x8x32xf32>
    %62 = vector.shape_cast %61 : vector<1x8x32xf32> to vector<8x32xf32>
    %63 = vector.broadcast %60 : vector<8x1xf32> to vector<8x32xf32>
    %64 = arith.mulf %63, %62 : vector<8x32xf32>
    %65 = arith.addf %59, %64 : vector<8x32xf32>
    %66 = vector.extract_strided_slice %24 {offsets = [0, 7], sizes = [8, 1], strides = [1, 1]} : vector<8x17xf32> to vector<8x1xf32>
    %c7 = arith.constant 7 : index
    %c0_30 = arith.constant 0 : index
    %c0_31 = arith.constant 0 : index
    %67 = vector.load %arg2[%c7, %c0_30, %c0_31] : memref<17x8x32xf32, #tpu.memory_space<vmem>>, vector<1x8x32xf32>
    %68 = vector.shape_cast %67 : vector<1x8x32xf32> to vector<8x32xf32>
    %69 = vector.broadcast %66 : vector<8x1xf32> to vector<8x32xf32>
    %70 = arith.mulf %69, %68 : vector<8x32xf32>
    %71 = arith.addf %65, %70 : vector<8x32xf32>
    %72 = vector.extract_strided_slice %24 {offsets = [0, 8], sizes = [8, 1], strides = [1, 1]} : vector<8x17xf32> to vector<8x1xf32>
    %c8 = arith.constant 8 : index
    %c0_32 = arith.constant 0 : index
    %c0_33 = arith.constant 0 : index
    %73 = vector.load %arg2[%c8, %c0_32, %c0_33] : memref<17x8x32xf32, #tpu.memory_space<vmem>>, vector<1x8x32xf32>
    %74 = vector.shape_cast %73 : vector<1x8x32xf32> to vector<8x32xf32>
    %75 = vector.broadcast %72 : vector<8x1xf32> to vector<8x32xf32>
    %76 = arith.mulf %75, %74 : vector<8x32xf32>
    %77 = arith.addf %71, %76 : vector<8x32xf32>
    %78 = vector.extract_strided_slice %24 {offsets = [0, 9], sizes = [8, 1], strides = [1, 1]} : vector<8x17xf32> to vector<8x1xf32>
    %c9 = arith.constant 9 : index
    %c0_34 = arith.constant 0 : index
    %c0_35 = arith.constant 0 : index
    %79 = vector.load %arg2[%c9, %c0_34, %c0_35] : memref<17x8x32xf32, #tpu.memory_space<vmem>>, vector<1x8x32xf32>
    %80 = vector.shape_cast %79 : vector<1x8x32xf32> to vector<8x32xf32>
    %81 = vector.broadcast %78 : vector<8x1xf32> to vector<8x32xf32>
    %82 = arith.mulf %81, %80 : vector<8x32xf32>
    %83 = arith.addf %77, %82 : vector<8x32xf32>
    %84 = vector.extract_strided_slice %24 {offsets = [0, 10], sizes = [8, 1], strides = [1, 1]} : vector<8x17xf32> to vector<8x1xf32>
    %c10 = arith.constant 10 : index
    %c0_36 = arith.constant 0 : index
    %c0_37 = arith.constant 0 : index
    %85 = vector.load %arg2[%c10, %c0_36, %c0_37] : memref<17x8x32xf32, #tpu.memory_space<vmem>>, vector<1x8x32xf32>
    %86 = vector.shape_cast %85 : vector<1x8x32xf32> to vector<8x32xf32>
    %87 = vector.broadcast %84 : vector<8x1xf32> to vector<8x32xf32>
    %88 = arith.mulf %87, %86 : vector<8x32xf32>
    %89 = arith.addf %83, %88 : vector<8x32xf32>
    %90 = vector.extract_strided_slice %24 {offsets = [0, 11], sizes = [8, 1], strides = [1, 1]} : vector<8x17xf32> to vector<8x1xf32>
    %c11 = arith.constant 11 : index
    %c0_38 = arith.constant 0 : index
    %c0_39 = arith.constant 0 : index
    %91 = vector.load %arg2[%c11, %c0_38, %c0_39] : memref<17x8x32xf32, #tpu.memory_space<vmem>>, vector<1x8x32xf32>
    %92 = vector.shape_cast %91 : vector<1x8x32xf32> to vector<8x32xf32>
    %93 = vector.broadcast %90 : vector<8x1xf32> to vector<8x32xf32>
    %94 = arith.mulf %93, %92 : vector<8x32xf32>
    %95 = arith.addf %89, %94 : vector<8x32xf32>
    %96 = vector.extract_strided_slice %24 {offsets = [0, 12], sizes = [8, 1], strides = [1, 1]} : vector<8x17xf32> to vector<8x1xf32>
    %c12 = arith.constant 12 : index
    %c0_40 = arith.constant 0 : index
    %c0_41 = arith.constant 0 : index
    %97 = vector.load %arg2[%c12, %c0_40, %c0_41] : memref<17x8x32xf32, #tpu.memory_space<vmem>>, vector<1x8x32xf32>
    %98 = vector.shape_cast %97 : vector<1x8x32xf32> to vector<8x32xf32>
    %99 = vector.broadcast %96 : vector<8x1xf32> to vector<8x32xf32>
    %100 = arith.mulf %99, %98 : vector<8x32xf32>
    %101 = arith.addf %95, %100 : vector<8x32xf32>
    %102 = vector.extract_strided_slice %24 {offsets = [0, 13], sizes = [8, 1], strides = [1, 1]} : vector<8x17xf32> to vector<8x1xf32>
    %c13 = arith.constant 13 : index
    %c0_42 = arith.constant 0 : index
    %c0_43 = arith.constant 0 : index
    %103 = vector.load %arg2[%c13, %c0_42, %c0_43] : memref<17x8x32xf32, #tpu.memory_space<vmem>>, vector<1x8x32xf32>
    %104 = vector.shape_cast %103 : vector<1x8x32xf32> to vector<8x32xf32>
    %105 = vector.broadcast %102 : vector<8x1xf32> to vector<8x32xf32>
    %106 = arith.mulf %105, %104 : vector<8x32xf32>
    %107 = arith.addf %101, %106 : vector<8x32xf32>
    %108 = vector.extract_strided_slice %24 {offsets = [0, 14], sizes = [8, 1], strides = [1, 1]} : vector<8x17xf32> to vector<8x1xf32>
    %c14 = arith.constant 14 : index
    %c0_44 = arith.constant 0 : index
    %c0_45 = arith.constant 0 : index
    %109 = vector.load %arg2[%c14, %c0_44, %c0_45] : memref<17x8x32xf32, #tpu.memory_space<vmem>>, vector<1x8x32xf32>
    %110 = vector.shape_cast %109 : vector<1x8x32xf32> to vector<8x32xf32>
    %111 = vector.broadcast %108 : vector<8x1xf32> to vector<8x32xf32>
    %112 = arith.mulf %111, %110 : vector<8x32xf32>
    %113 = arith.addf %107, %112 : vector<8x32xf32>
    %114 = vector.extract_strided_slice %24 {offsets = [0, 15], sizes = [8, 1], strides = [1, 1]} : vector<8x17xf32> to vector<8x1xf32>
    %c15 = arith.constant 15 : index
    %c0_46 = arith.constant 0 : index
    %c0_47 = arith.constant 0 : index
    %115 = vector.load %arg2[%c15, %c0_46, %c0_47] : memref<17x8x32xf32, #tpu.memory_space<vmem>>, vector<1x8x32xf32>
    %116 = vector.shape_cast %115 : vector<1x8x32xf32> to vector<8x32xf32>
    %117 = vector.broadcast %114 : vector<8x1xf32> to vector<8x32xf32>
    %118 = arith.mulf %117, %116 : vector<8x32xf32>
    %119 = arith.addf %113, %118 : vector<8x32xf32>
    %120 = vector.extract_strided_slice %24 {offsets = [0, 16], sizes = [8, 1], strides = [1, 1]} : vector<8x17xf32> to vector<8x1xf32>
    %c16 = arith.constant 16 : index
    %c0_48 = arith.constant 0 : index
    %c0_49 = arith.constant 0 : index
    %121 = vector.load %arg2[%c16, %c0_48, %c0_49] : memref<17x8x32xf32, #tpu.memory_space<vmem>>, vector<1x8x32xf32>
    %122 = vector.shape_cast %121 : vector<1x8x32xf32> to vector<8x32xf32>
    %123 = vector.broadcast %120 : vector<8x1xf32> to vector<8x32xf32>
    %124 = arith.mulf %123, %122 : vector<8x32xf32>
    %125 = arith.addf %119, %124 : vector<8x32xf32>
    %126 = arith.mulf %125, %20 : vector<8x32xf32>
    %127 = arith.addf %23, %126 : vector<8x32xf32>
    %c0_50 = arith.constant 0 : index
    %c0_51 = arith.constant 0 : index
    %128 = vector.load %arg9[%c0_50, %c0_51] : memref<8x32xf32, #tpu.memory_space<vmem>>, vector<8x32xf32>
    tpu.vector_store %arg9[%c0_50, %c0_51], %127 {strides = array<i32>} : memref<8x32xf32, #tpu.memory_space<vmem>>, vector<8x32xf32>,
    %129 = vector.extract_strided_slice %18 {offsets = [0, 0], sizes = [8, 17], strides = [1, 1]} : vector<8x49xf32> to vector<8x17xf32>
    %cst_52 = arith.constant dense<0.000000e+00> : vector<8xf32>
    %130 = vector.multi_reduction <add>, %129, %cst_52 [1] : vector<8x17xf32> to vector<8xf32>
    %131 = vector.shape_cast %130 : vector<8xf32> to vector<8x1xf32>
    %132 = vector.extract_strided_slice %18 {offsets = [0, 17], sizes = [8, 32], strides = [1, 1]} : vector<8x49xf32> to vector<8x32xf32>
    %cst_53 = arith.constant dense<0.000000e+00> : vector<8xf32>
    %133 = vector.multi_reduction <add>, %132, %cst_53 [1] : vector<8x32xf32> to vector<8xf32>
    %134 = vector.shape_cast %133 : vector<8xf32> to vector<8x1xf32>
    %135 = vector.extract_strided_slice %14 {offsets = [0, 0], sizes = [8, 17], strides = [1, 1]} : vector<8x49xf32> to vector<8x17xf32>
    %cst_54 = arith.constant dense<0.000000e+00> : vector<8xf32>
    %136 = vector.multi_reduction <add>, %135, %cst_54 [1] : vector<8x17xf32> to vector<8xf32>
    %137 = vector.shape_cast %136 : vector<8xf32> to vector<8x1xf32>
    %138 = vector.extract_strided_slice %14 {offsets = [0, 17], sizes = [8, 32], strides = [1, 1]} : vector<8x49xf32> to vector<8x32xf32>
    %cst_55 = arith.constant dense<0.000000e+00> : vector<8xf32>
    %139 = vector.multi_reduction <add>, %138, %cst_55 [1] : vector<8x32xf32> to vector<8xf32>
    %140 = vector.shape_cast %139 : vector<8xf32> to vector<8x1xf32>
    %141 = arith.mulf %13, %13 : vector<8x17xf32>
    %c0_56 = arith.constant 0 : index
    %c0_57 = arith.constant 0 : index
    %142 = vector.load %arg8[%c0_56, %c0_57] : memref<1x17xf32, #tpu.memory_space<vmem>>, vector<1x17xf32>
    %143 = vector.broadcast %142 : vector<1x17xf32> to vector<8x17xf32>
    %144 = arith.mulf %141, %143 : vector<8x17xf32>
    %cst_58 = arith.constant dense<0.000000e+00> : vector<8xf32>
    %145 = vector.multi_reduction <add>, %144, %cst_58 [1] : vector<8x17xf32> to vector<8xf32>
    %146 = vector.shape_cast %145 : vector<8xf32> to vector<8x1xf32>
    %147 = arith.mulf %131, %134 : vector<8x1xf32>
    %148 = arith.addf %147, %146 : vector<8x1xf32>
    %cst_59 = arith.constant 5.440000e+02 : f32
    %149 = vector.broadcast %cst_59 : f32 to vector<8x1xf32>
    %150 = arith.subf %148, %149 : vector<8x1xf32>
    %cst_60 = arith.constant 3.200000e+01 : f32
    %151 = vector.broadcast %cst_60 : f32 to vector<8x1xf32>
    %152 = arith.mulf %151, %137 : vector<8x1xf32>
    %153 = arith.subf %150, %152 : vector<8x1xf32>
    %cst_61 = arith.constant 1.700000e+01 : f32
    %154 = vector.broadcast %cst_61 : f32 to vector<8x1xf32>
    %155 = arith.mulf %154, %140 : vector<8x1xf32>
    %156 = arith.subf %153, %155 : vector<8x1xf32>
    %cst_62 = arith.constant 5.000000e-01 : f32
    %157 = vector.broadcast %cst_62 : f32 to vector<8x1xf32>
    %158 = arith.mulf %157, %156 : vector<8x1xf32>
    %c0_63 = arith.constant 0 : index
    %c0_64 = arith.constant 0 : index
    %159 = vector.load %arg10[%c0_63, %c0_64] : memref<8x1xf32, #tpu.memory_space<vmem>>, vector<8x1xf32>
    tpu.vector_store %arg10[%c0_63, %c0_64], %158 {strides = array<i32>} : memref<8x1xf32, #tpu.memory_space<vmem>>, vector<8x1xf32>,
    return
  }
  func.func @transform_0(%arg0: i32) -> (i32, i32) {
    %c0_i32 = arith.constant 0 : i32
    %c0_i32_0 = arith.constant 0 : i32
    return %arg0, %c0_i32 : i32, i32
  }
  func.func @transform_1(%arg0: i32) -> (i32, i32, i32) {
    %c0_i32 = arith.constant 0 : i32
    %c0_i32_0 = arith.constant 0 : i32
    %c0_i32_1 = arith.constant 0 : i32
    return %c0_i32, %arg0, %c0_i32_0 : i32, i32, i32
  }
  func.func @transform_2(%arg0: i32) -> (i32, i32) {
    %c0_i32 = arith.constant 0 : i32
    %c0_i32_0 = arith.constant 0 : i32
    %c0_i32_1 = arith.constant 0 : i32
    return %c0_i32, %c0_i32_0 : i32, i32
  }
  func.func @transform_3(%arg0: i32) -> (i32, i32) {
    %c0_i32 = arith.constant 0 : i32
    %c0_i32_0 = arith.constant 0 : i32
    %c0_i32_1 = arith.constant 0 : i32
    return %c0_i32, %c0_i32_0 : i32, i32
  }
  func.func @transform_4(%arg0: i32) -> (i32, i32) {
    %c0_i32 = arith.constant 0 : i32
    %c0_i32_0 = arith.constant 0 : i32
    %c0_i32_1 = arith.constant 0 : i32
    return %c0_i32, %c0_i32_0 : i32, i32
  }
  func.func @transform_5(%arg0: i32) -> (i32, i32) {
    %c0_i32 = arith.constant 0 : i32
    %c0_i32_0 = arith.constant 0 : i32
    %c0_i32_1 = arith.constant 0 : i32
    return %c0_i32, %c0_i32_0 : i32, i32
  }
  func.func @transform_6(%arg0: i32) -> (i32, i32) {
    %c0_i32 = arith.constant 0 : i32
    %c0_i32_0 = arith.constant 0 : i32
    %c0_i32_1 = arith.constant 0 : i32
    return %c0_i32, %c0_i32_0 : i32, i32
  }
  func.func @transform_7(%arg0: i32) -> (i32, i32) {
    %c0_i32 = arith.constant 0 : i32
    %c0_i32_0 = arith.constant 0 : i32
    %c0_i32_1 = arith.constant 0 : i32
    return %c0_i32, %c0_i32_0 : i32, i32
  }
  func.func @transform_8(%arg0: i32) -> (i32, i32) {
    %c0_i32 = arith.constant 0 : i32
    %c0_i32_0 = arith.constant 0 : i32
    return %arg0, %c0_i32 : i32, i32
  }
  func.func @transform_9(%arg0: i32) -> (i32, i32) {
    %c0_i32 = arith.constant 0 : i32
    %c0_i32_0 = arith.constant 0 : i32
    return %arg0, %c0_i32 : i32, i32
  }
}

</mosaic_0001>

<bundles_post_ra>
// kernel: tpu_custom_call.1
= control target key start
LH: loop header
LB: loop body
LE: loop exit
PB: predicated region body
PF: predicated region fallthrough
CT: control target
= control target key end

     0   :  { %s1974_s0 = inlined_call_operand.hbm [shape: f32[16,17], index: 0, kind: input, shape index: {}]   ;;  %s1975_s1 = inlined_call_operand.hbm [shape: f32[17,16,32], index: 1, kind: input, shape index: {}]   ;;  %s1976_s2 = inlined_call_operand.hbm [shape: f32[17,32], index: 2, kind: input, shape index: {}]   ;;  %s1977_s3 = inlined_call_operand.vmem [shape: f32[1,32], index: 3, kind: input, shape index: {}]   ;;  %s1978_s4 = inlined_call_operand.hbm [shape: f32[32,66], index: 4, kind: input, shape index: {}]   ;;  %s1979_s5 = inlined_call_operand.vmem [shape: f32[1,66], index: 5, kind: input, shape index: {}]   ;;  %s1980_s6 = inlined_call_operand.hbm [shape: f32[17,32], index: 6, kind: input, shape index: {}]   ;;  %s1981_s7 = inlined_call_operand.vmem [shape: f32[1,17], index: 7, kind: input, shape index: {}]   ;;  %s1982_s8 = inlined_call_operand.hbm [shape: f32[16,32], index: 8, kind: output, shape index: {0}]   ;;  %s1983_s9 = inlined_call_operand.vmem [shape: f32[16,1], index: 9, kind: output, shape index: {1}]  }
   0x1   :  { %1991 = sst [smem:[#allocation19_spill]] %s1974_s0 }
   0x2   :  { %1992 = sst [smem:[#allocation20_spill]] %s1976_s2 }
   0x3   :  { %1993 = sst [smem:[#allocation21_spill]] %s1978_s4 }
   0x4   :  { %1994 = sst [smem:[#allocation22_spill]] %s1983_s9 }
   0x5   :  { %15 = vsyncpa [#allocation3], 0 }
   0x6   :  { %17 = vsyncpa [#allocation3 + $0x1], 0 }
   0x7   :  { %18 = vsyncpa [#allocation6], 0 }
   0x8   :  { %20 = vsyncpa [#allocation6 + $0x1], 0 }
   0x9   :  { %21 = vsyncpa [#allocation9], 0 }
   0xa   :  { %22 = vsyncpa [#allocation4], 0 }
   0xb   :  { %24 = vsyncpa [#allocation4 + $0x1], 0  ;;  %s1591_s30 = smov 0   ;;  %s1593_s10 = smov 0  }
   0xc   :  { %s1595_s11 = smov 0   ;;  %s1597_s12 = smov 0  }
   0xd LB: > { %1995 = sst [smem:[#allocation17_spill]] %s1496_s30  ;;  %s1612_s13 = sadd.s32 4294967295, %s1508_s12   ;;  %s1508_s12 = sphi %s1597_s12, %s2025_s12   ;;  %s1504_s11 = sphi %s1595_s11, %s2024_s11   ;;  %s1500_s10 = sphi %s1593_s10, %s2023_s10   ;;  %s1496_s30 = sphi %s1591_s30, %s2022_s30  }
   0xe   : > { %s1059_s14 = sadd.s32 4294967294, %s1508_s12   ;;  %p50_p0 = scmp.ne.s32.totalorder %s1500_s10, %s1496_s30 }
   0xf   : > { %p1984_p1 = scmp.eq.s32.totalorder %s1612_s13, 0  ;;  %p232_p3 = scmp.eq.s32.totalorder %s1059_s14, 1 }
  0x10   : > { %p1060_p5 = scmp.ge.s32.totalorder %s1508_s12, 1  ;;  %p265_p7 = scmp.lt.s32.totalorder %s1508_s12, 3 }
  0x11   : > { %p1621_p4 = por %p1984_p1, %p50_p0  ;;  %p1626_p6 = por %p232_p3, %p50_p0 }
  0x12   : > { %p1631_p8 = pnand %p1060_p5, %p265_p7  ;;  %s1510_s18 = smov [#allocation7]  }
  0x13   : > { %s1996_s15 = scalar_select %p1621_p4, 1, 0 }
  0x14   : > { %s1997_s16 = scalar_select %p1626_p6, 1, 0 }
  0x15   : > { %s1999_s17 = scalar_select %p1631_p8, 1, 0 }
  0x16   : > { %1998 = sst [smem:[#allocation18_spill]] %s1997_s16  ;;  %s277_s19 = sshll.u32 %s1510_s18, 4  ;;  %s1635_s19 = int_to_ptr.vmem [resolvable:$true] %s277_s19 }
  0x17   : > { %p1178_p9 = pneg %p1631_p8  ;;  %s1511_s21 = smov [#allocation8]  }
  0x18   : > { %s293_s22 = sshll.u32 %s1511_s21, 4  ;;  %s1512_s23 = smov [#allocation10]   ;;  %s1646_s22 = int_to_ptr.vmem [resolvable:$true] %s293_s22 }
  0x19   : > { %p1642_p11 = pnand %p1178_p9, %p1984_p1  ;;  %s1648_s24 = sshll.u32 %s1512_s23, 4  ;;  %s310_s24 = int_to_ptr.vmem [resolvable:$true] %s1648_s24 }
  0x1a   : > { %s2001_s2 = sld [smem:[#allocation20_spill]] }
  0x1b   : > { %p1658_p13 = pneg %p1642_p11 }
  0x20   : > { %s1286_s27 = scalar_lea.hbm %s2001_s2, 384 }
  0x21   : > { %p1287_p12 = scmp.ne.s32.totalorder %s2001_s2, %s1286_s27  ;;  %p1293_p5 = scmp.lt.u32.totalorder %s1286_s27, %s2001_s2 }
  0x23   : > { %p1289_p0 = pnand %p1658_p13, %p1287_p12 }
  0x25   : > { %p1290_p3 = pneg %p1289_p0 }
  0x27   : > { %p1295_p7 = pnand %p1293_p5, %p1290_p3 }
  0x29   : > { %1298 = shalt.err (!%p1295_p7)
}
  0x2a   : > { %s1299_s23 = scalar_lea.vmem %s1635_s19, 384  ;;  %p1307_p2 = scmp.lt.s32.totalorder %s1635_s19, %s1635_s19 }
  0x2b   : > { %p1300_p9 = scmp.ne.s32.totalorder %s1635_s19, %s1299_s23  ;;  %p1308_p6 = scmp.lt.s32.totalorder %s1299_s23, %s1299_s23 }
  0x2d   : > { %p1302_p10 = pnand %p1300_p9, %p1658_p13  ;;  %p1309_p12 = por %p1308_p6, %p1307_p2 }
  0x2f   : > { %p1303_p1 = pneg %p1302_p10 }
  0x31   : > { %p1310_p0 = pnand %p1309_p12, %p1303_p1 }
  0x33   : > { %1313 = shalt.err (!%p1310_p0)
}
  0x34   : > { %s1989_s25 = smov 128   ;;  %s1990_s26 = smov 8  }
  0x35   : > { %1181 = dma.hbm_to_vmem [thread:$0]  (!%p1642_p11), %s2001_s2, 384, %s1635_s19, [#allocation6], %s1989_s25, %s1989_s25, %s1990_s26  }
  0x36   : > { %s2003_s4 = sld [smem:[#allocation21_spill]] }
  0x3c   : > { %s1314_s21 = scalar_lea.hbm %s2003_s4, 512 }
  0x3d   : > { %p1315_p1 = scmp.ne.s32.totalorder %s2003_s4, %s1314_s21  ;;  %p1321_p10 = scmp.lt.u32.totalorder %s1314_s21, %s2003_s4 }
  0x3f   : > { %p1317_p2 = pnand %p1315_p1, %p1658_p13 }
  0x41   : > { %p1318_p6 = pneg %p1317_p2 }
  0x43   : > { %p1323_p3 = pnand %p1321_p10, %p1318_p6 }
  0x45   : > { %1326 = shalt.err (!%p1323_p3)
}
  0x46   : > { %s1327_s19 = scalar_lea.vmem %s1646_s22, 512  ;;  %p1335_p12 = scmp.lt.s32.totalorder %s1646_s22, %s1646_s22 }
  0x47   : > { %p1328_p5 = scmp.ne.s32.totalorder %s1646_s22, %s1327_s19  ;;  %p1336_p0 = scmp.lt.s32.totalorder %s1327_s19, %s1327_s19 }
  0x49   : > { %p1330_p7 = pnand %p1328_p5, %p1658_p13  ;;  %p1337_p1 = por %p1336_p0, %p1335_p12 }
  0x4b   : > { %p1331_p9 = pneg %p1330_p7 }
  0x4d   : > { %p1338_p2 = pnand %p1337_p1, %p1331_p9 }
  0x4f   : > { %1341 = shalt.err (!%p1338_p2)
}
  0x50   : > { %1184 = dma.hbm_to_vmem [thread:$0]  (!%p1642_p11), %s2003_s4, 512, %s1646_s22, [#allocation9], %s1989_s25, %s1989_s25, %s1990_s26  }
  0x51   : > { %s1342_s28 = scalar_lea.hbm %s1980_s6, 384 }
  0x52   : > { %p1343_p6 = scmp.ne.s32.totalorder %s1980_s6, %s1342_s28  ;;  %p1349_p5 = scmp.lt.u32.totalorder %s1342_s28, %s1980_s6 }
  0x54   : > { %p1345_p10 = pnand %p1343_p6, %p1658_p13 }
  0x56   : > { %p1346_p3 = pneg %p1345_p10 }
  0x58   : > { %p1351_p7 = pnand %p1349_p5, %p1346_p3 }
  0x5a   : > { %1354 = shalt.err (!%p1351_p7)
}
  0x5b   : > { %s1355_s19 = scalar_lea.vmem %s310_s24, 384  ;;  %p1363_p1 = scmp.lt.s32.totalorder %s310_s24, %s310_s24 }
  0x5c   : > { %p1356_p9 = scmp.ne.s32.totalorder %s310_s24, %s1355_s19  ;;  %p1364_p2 = scmp.lt.s32.totalorder %s1355_s19, %s1355_s19 }
  0x5e   : > { %p1358_p12 = pnand %p1356_p9, %p1658_p13  ;;  %p1365_p4 = por %p1364_p2, %p1363_p1 }
  0x60   : > { %p1359_p0 = pneg %p1358_p12 }
  0x62   : > { %p1366_p8 = pnand %p1365_p4, %p1359_p0 }
  0x64   : > { %1369 = shalt.err (!%p1366_p8)
}
  0x65   : > { %1187 = dma.hbm_to_vmem [thread:$0]  (!%p1642_p11), %s1980_s6, 384, %s310_s24, [#allocation9], %s1989_s25, %s1989_s25, %s1990_s26  }
  0x66   : > { %s1731_s14 = sadd.s32 1, %s1508_s12   ;;  %s37_s30 = sadd.s32 1, %s1504_s11 }
  0x67   : > { %s34_s20 = ssub.s32 %s1508_s12, %s1731_s14  ;;  %p44_p8 = scmp.ne.s32.totalorder %s1504_s11, %s1500_s10 }
  0x68   : > { %p35_p4 = scmp.eq.s32.totalorder %s34_s20, 0  ;;  %p45_p13 = scmp.eq.s32.totalorder %s1508_s12, 0 }
  0x69   : > { %p1202_p6 = scmp.lt.s32.totalorder %s1508_s12, 2  ;;  %p2004_p3 = scmp.eq.s32.totalorder %s1612_s13, 1 }
  0x6a   : > { %s1741_s16 = scalar_select %p35_p4, %s1504_s11, %s37_s30  }
  0x6b   : > { %p46_p10 = por %p45_p13, %p44_p8  ;;  %p1745_p5 = por %p2004_p3, %p44_p8 }
  0x6c   : > { %s1750_s28 = sand.u32 1, %s1504_s11   ;;  %s1066_s24 = sshll.u32 %s1508_s12, 7 }
  0x6d   : > { %s1065_s29 = sshll.u32 %s1750_s28, 3  ;;  %s2006_s0 = sld [smem:[#allocation19_spill]] }
  0x6e   : > { %s330_s19 = scalar_lea.vmem [#allocation2], %s1065_s29  ;;  %p1759_p11 = pnand %p1202_p6, %p46_p10 }
  0x6f   : > { %s337_s22 = sshll.u32 %s330_s19, 4  ;;  %s1769_s18 = scalar_lea.hbm %s1975_s1, %s1066_s24  ;;  %s1763_s22 = int_to_ptr.vmem [resolvable:$true] %s337_s22 }
  0x70   : > { %s327_s21 = scalar_lea.sflag [#allocation3], %s1750_s28  ;;  %p1372_p9 = pneg %p1759_p11 }
  0x73   : > { %s1757_s23 = scalar_lea.hbm %s2006_s0, %s1066_s24  ;;  %s1375_s2 = scalar_lea.hbm %s2006_s0, 256 }
  0x74   : > { %s1370_s26 = scalar_lea.hbm %s1757_s23, 128  ;;  %p1376_p1 = scmp.lt.u32.totalorder %s1757_s23, %s2006_s0 }
  0x75   : > { %p1371_p7 = scmp.ne.s32.totalorder %s1757_s23, %s1370_s26  ;;  %p1377_p2 = scmp.lt.u32.totalorder %s1375_s2, %s1370_s26 }
  0x76   : > { %p1379_p8 = scmp.lt.u32.totalorder %s1370_s26, %s1757_s23 }
  0x77   : > { %p1373_p12 = pnand %p1372_p9, %p1371_p7  ;;  %p1378_p4 = por %p1377_p2, %p1376_p1 }
  0x79   : > { %p1374_p0 = pneg %p1373_p12  ;;  %p1380_p13 = por %p1379_p8, %p1378_p4 }
  0x7b   : > { %p1381_p6 = pnand %p1380_p13, %p1374_p0 }
  0x7d   : > { %1384 = shalt.err (!%p1381_p6)
}
  0x7e   : > { %s1385_s25 = scalar_lea.vmem %s1763_s22, 128  ;;  %s1515_s24 = smov [#allocation2]  }
  0x7f   : > { %p1386_p10 = scmp.ne.s32.totalorder %s1763_s22, %s1385_s25  ;;  %s1390_s30 = sshll.u32 %s1515_s24, 4  ;;  %s1391_s30 = int_to_ptr.vmem [resolvable:$false] %s1390_s30 }
  0x80   : > { %s1392_s4 = scalar_lea.vmem %s1391_s30, 256  ;;  %p1393_p12 = scmp.lt.s32.totalorder %s1763_s22, %s1391_s30 }
  0x81   : > { %p1388_p3 = pnand %p1386_p10, %p1372_p9  ;;  %p1394_p1 = scmp.lt.s32.totalorder %s1392_s4, %s1385_s25 }
  0x83   : > { %p1389_p7 = pneg %p1388_p3  ;;  %p1395_p2 = por %p1394_p1, %p1393_p12 }
  0x85   : > { %p1396_p4 = pnand %p1395_p2, %p1389_p7 }
  0x87   : > { %1399 = shalt.err (!%p1396_p4)
}
  0x88   : > { %1191 = dma.hbm_to_vmem [thread:$0]  (!%p1759_p11), %s1757_s23, 128, %s1763_s22, %s327_s21  }
  0x89   : > { %s344_s2 = sand.u32 1, %s1508_s12   ;;  %s2008_s26 = smul.u32 136, %s1750_s28 }
  0x8a   : > { %s1802_s19 = scalar_lea.sflag [#allocation6], %s344_s2  ;;  %s1400_s25 = scalar_lea.hbm %s1769_s18, 2176 }
  0x8b   : > { %s348_s20 = scalar_lea.vmem [#allocation5], %s2008_s26  ;;  %p1401_p0 = scmp.ne.s32.totalorder %s1769_s18, %s1400_s25 }
  0x8c   : > { %s354_s29 = sshll.u32 %s348_s20, 4  ;;  %s1405_s4 = scalar_lea.hbm %s1975_s1, 4352  ;;  %s1800_s29 = int_to_ptr.vmem [resolvable:$true] %s354_s29 }
  0x8d   : > { %p1403_p8 = pnand %p1401_p0, %p1372_p9  ;;  %p1406_p6 = scmp.lt.u32.totalorder %s1769_s18, %s1975_s1 }
  0x8e   : > { %p1407_p10 = scmp.lt.u32.totalorder %s1405_s4, %s1400_s25  ;;  %p1409_p7 = scmp.lt.u32.totalorder %s1400_s25, %s1769_s18 }
  0x8f   : > { %p1404_p13 = pneg %p1403_p8 }
  0x90   : > { %p1408_p3 = por %p1407_p10, %p1406_p6 }
  0x92   : > { %p1410_p12 = por %p1409_p7, %p1408_p3 }
  0x94   : > { %p1411_p1 = pnand %p1410_p12, %p1404_p13 }
  0x96   : > { %1414 = shalt.err (!%p1411_p1)
}
  0x97   : > { %s1415_s28 = scalar_lea.vmem %s1800_s29, 2176  ;;  %s1516_s22 = smov [#allocation5]  }
  0x98   : > { %p1416_p2 = scmp.ne.s32.totalorder %s1800_s29, %s1415_s28  ;;  %s1420_s21 = sshll.u32 %s1516_s22, 4  ;;  %s1421_s21 = int_to_ptr.vmem [resolvable:$false] %s1420_s21 }
  0x99   : > { %s1422_s0 = scalar_lea.vmem %s1421_s21, 4352  ;;  %p1423_p8 = scmp.lt.s32.totalorder %s1800_s29, %s1421_s21 }
  0x9a   : > { %p1418_p4 = pnand %p1416_p2, %p1372_p9  ;;  %p1424_p6 = scmp.lt.s32.totalorder %s1422_s0, %s1415_s28 }
  0x9c   : > { %p1419_p0 = pneg %p1418_p4  ;;  %p1425_p10 = por %p1424_p6, %p1423_p8 }
  0x9e   : > { %p1426_p3 = pnand %p1425_p10, %p1419_p0 }
  0xa0   : > { %1429 = shalt.err (!%p1426_p3)
}
  0xa1   : > { %s1517_s2 = smov 256   ;;  %s2009_s26 = smov 8  }
  0xa2   : > { %s2010_s20 = smov 128   ;;  %p2011_p9 = scmp.ne.s32.totalorder %s1999_s17, 0 }
  0xa3   : > { %1194 = dma.hbm_to_vmem [thread:$0]  (!%p1759_p11), %s1769_s18, 2176, %s1800_s29, %s1802_s19, %s1517_s2, %s2010_s20, %s2009_s26  }
  0xa4   : > { %366 = sbr.rel (%p2011_p9) target bundleno = 995 (0x3e3), region = 52  ;;  %s1833_s25 = sand.u32 (!%p2011_p9), 1, %s1500_s10  }
  0xa5   : > { %s1069_s24 = sshll.u32 (!%p2011_p9), %s1833_s25, 3  ;;  %s369_s30 = scalar_lea.sflag (!%p2011_p9), [#allocation3], %s1833_s25 }
  0xa6   : > { %s1839_s9 = scalar_lea.vmem (!%p2011_p9), [#allocation2], %s1069_s24  ;;  %p2012_p13 = scmp.ne.s32.totalorder (!%p2011_p9), %s1996_s15, 0 }
  0xab   : > { %1475 = dma.done.wait (%p2012_p13), %s369_s30, 128  }
  0xac   : > { %1477 = vsyncadd (%p2012_p13), %s369_s30, 4294967168  ;;  %s377_s17 = sand.u32 1, %s1612_s13   ;;  %s1159_s18 = smul.u32 136, %s1833_s25 }
  0xad   : > { %s378_s29 = scalar_lea.sflag [#allocation6], %s377_s17 }
  0xae   : > { %s1847_s19 = scalar_lea.vmem [#allocation5], %s1159_s18 }
  0xaf   : > { %1479 = dma.done.wait (%p2012_p13), %s378_s29, 2176  }
  0xb0   : > { %1481 = vsyncadd (%p2012_p13), %s378_s29, 4294965120  ;;  %p2013_p11 = scmp.eq.s32.totalorder %s1612_s13, 0 }
  0xb2   : > { %1483 = dma.done.wait (%p2013_p11), [#allocation6], 384   ;;  %p2014_p7 = pmov %p2013_p11 }
  0xb4   : > { %1485 = vsyncadd (%p2014_p7), [#allocation6], 4294966912  ;;  %p2015_p12 = pmov %p2014_p7 }
  0xb5   : > { %p2016_p1 = pmov %p2014_p7 }
  0xb6   : > { %1487 = dma.done.wait (%p2015_p12), [#allocation9], 896  }
  0xb7   : > { %1489 = vsyncadd (%p2016_p1), [#allocation9], 4294966400  ;;  %v1518_v0 = vmov 0.0|0.0   ;;  %vm1519_vm0 = vmmov 0   ;;  %v1520_v1 = vmov 0.0   ;;  %v442_v2 = vld [vmem:[#allocation7] sm:$0xff] }
  0xb8   : > { %1146 = vmatprep.subr.bf16.mxu0 %v1518_v0  ;;  %1123 = vmatprep.mubr.msk.f32.mxu0 %vm1519_vm0, %v1520_v1  ;;  %v443_v3 = vld [vmem:[#allocation7 + $0x8] sm:$0xff]  ;;  %v531_v5 = vld [vmem:[#allocation8] sm:$0xff]  ;;  %v532_v6 = vld [vmem:[#allocation8 + $0x8] sm:$0xff]  ;;  %vm456_vm1 = vcmask 1040384   ;;  %vm452_vm2 = vcmask 138240   ;;  %vm542_vm3 = vcmask 261120  }
  0xb9   : > { %1149 = vmatprep.subr.bf16.mxu1 %v1518_v0  ;;  %1134 = vmatprep.mubr.msk.f32.mxu1 %vm1519_vm0, %v1520_v1  ;;  %v1147_v4 = vpack.c.bf16 %v443_v3, %v442_v2  ;;  %v1150_v7 = vpack.c.bf16 %v532_v6, %v531_v5  ;;  %v444_v8 = vld [vmem:[#allocation7 + $0x10] sm:$0x1]  ;;  %v441_v9 = vld [vmem:[%s1839_s9] sm:$0xff]  ;;  %v621_v18 = vld [vmem:[#allocation10] sm:$0xff]  ;;  %s1521_s22 = smov 94   ;;  %s1522_s21 = smov 111  }
  0xba   : > { %v533_v10 = vld [vmem:[#allocation8 + $0x10] sm:$0xff]  ;;  %v534_v11 = vld [vmem:[#allocation8 + $0x18] sm:$0xff]  ;;  %v1075_v13 = vld [vmem:[%s1977_s3] ss:$0 sm:$0xff]  ;;  %v1523_v29 = vmov 1   ;;  %v1524_v30 = vmov 0  }
  0xbb   : > { %1148 = vmatpush3.bf16.msra.mxu0 %v1147_v4  ;;  %1151 = vmatpush3.bf16.msra.mxu1 %v1150_v7  ;;  %v1153_v12 = vpack.c.bf16 %v534_v11, %v533_v10  ;;  %v622_v19 = vld [vmem:[#allocation10 + $0x8] sm:$0xff]  ;;  %v623_v21 = vld [vmem:[#allocation10 + $0x10] sm:$0x1]  ;;  %v1525_v36 = vmov 2   ;;  %v1526_v37 = vmov 4   ;;  %v1527_v38 = vmov 3  }
  0xbc   : > { %1121 = vmatprep.subr.mxu0 %v1520_v1  ;;  %1152 = vmatprep.subr.bf16.mxu1 %v1518_v0  ;;  %v1156_v20 = vpack.c.bf16 %v622_v19, %v621_v18  ;;  %v1078_v22 = vld [vmem:[%s1979_s5] ss:$0 sm:$0xff]  ;;  %v1528_v39 = vmov 7   ;;  %v1529_v40 = vmov 5   ;;  %v1530_v41 = vmov 10   ;;  %v629_v3 = vld [vmem:[%s1847_s19] sm:$0xff] }
  0xbd   : > { %1268 = vset.pattern.permute.xlu1 %v1523_v29  ;;  %1267 = vset.pattern.permute.xlu0 %v1524_v30  ;;  %v1531_v42 = vmov 6   ;;  %v1532_v43 = vmov 13   ;;  %v1533_v44 = vmov 8   ;;  %v1534_v45 = vmov 16   ;;  %v1098_v55 = vld [vmem:[%s1981_s7] ss:$0 sm:$0xff] }
  0xbe   : > { %v1535_v46 = vmov 9   ;;  %v1536_v47 = vmov 11   ;;  %v1537_v48 = vmov 12   ;;  %v1538_v50 = vmov 14   ;;  %v1080_v2 = vld [vmem:[%s1847_s19 + $0x8] sm:$0xff]  ;;  %v1081_v5 = vld [vmem:[%s1847_s19 + $0x10] sm:$0xff] }
  0xbf   : > { %1122 = vmatpush3.msk.msra.mxu0 %vm456_vm1, %v444_v8  ;;  %1154 = vmatpush3.bf16.msra.mxu1 %v1153_v12  ;;  %v1539_v52 = vmov 15   ;;  %v1082_v10 = vld [vmem:[%s1847_s19 + $0x18] sm:$0xff]  ;;  %v1084_v18 = vld [vmem:[%s1847_s19 + $0x28] sm:$0xff]  ;;  %v1087_v30 = vld [vmem:[%s1847_s19 + $0x40] sm:$0xff]  ;;  %s1101_s26 = sshll.u32 %s1612_s13, 7  ;;  %s430_s20 = scalar_lea.vmem [#allocation11], %s1069_s24 }
  0xc0   : > { %1124 = vmatmul.mubr.msk.f32.vlgmr.msra.gmra.mrb[0].mxu0 %vm452_vm2, %v441_v9  ;;  %1155 = vmatprep.subr.bf16.mxu0 %v1518_v0  ;;  %s911_s30 = sshll.u32 %s430_s20, 4  ;;  %s1924_s18 = scalar_lea.hbm %s1982_s8, %s1101_s26  ;;  %s1926_s30 = int_to_ptr.vmem [resolvable:$true] %s911_s30 }
  0xc1   : > { %1143 = vmatprep.mubr.msk.f32.mxu0 %vm1519_vm0, %v1520_v1  ;;  %1157 = vmatpush3.bf16.msra.mxu0 %v1156_v20  ;;  %s894_s29 = scalar_lea.sflag [#allocation4], %s1833_s25  ;;  %s1540_s24 = smov [#allocation11]  }
  0xc2   : > { %1141 = vmatprep.subr.mxu0 %v1520_v1  ;;  %s1434_s15 = sshll.u32 %s1540_s24, 4  ;;  %s1435_s15 = int_to_ptr.vmem [resolvable:$false] %s1434_s15 }
  0xc3   : > { %s1436_s4 = scalar_lea.vmem %s1435_s15, 256  ;;  %p1437_p8 = scmp.lt.s32.totalorder %s1926_s30, %s1435_s15 }
  0xc5   : > { %1142 = vmatpush3.msk.msra.mxu0 %vm456_vm1, %v623_v21 }
 0x193   : > { %v526_v14 = vpop.f32.mrb[0].mxu0 }
 0x194   : > { %v527_v15 = vadd.f32 %v1075_v13, %v526_v14  ;;  %v1125_v16 = vpop.f32.mrb[1].mxu0 }
 0x196   : > { %v530_v17 = vmax.f32 %v527_v15, 0.0  ;;  %v1083_v15 = vld [vmem:[%s1847_s19 + $0x20] sm:$0xff] }
 0x198   : > { %1135 = vmatmul.mubr.msk.f32.vlgmr.msra.gmra.mrb[0].mxu1 %vm542_vm3, %v530_v17 }
 0x26b   : > { %v612_v23 = vpop.f32.mrb[0].mxu1 }
 0x26c   : > { %v1875_v24 = vadd.f32 %v1078_v22, %v612_v23  ;;  %v1136_v25 = vpop.f32.mrb[1].mxu1  ;;  %v1085_v23 = vld [vmem:[%s1847_s19 + $0x30] sm:$0xff] }
 0x26e   : > { %v616_v26 = vmul.f32 0.5, %v1875_v24  ;;  %865 = vrot.lane.b32.xlu1 %v1875_v24, %s1521_s22  ;;  %859 = vrot.lane.b32.xlu0 %v1875_v24, %s1522_s21  ;;  %v620_v27 = vmul.f32 %v1875_v24, %v441_v9  ;;  %v871_v53 = vmul.f32 %v1875_v24, %v1875_v24 }
 0x270   : > { %v617_v28 = vmul.f32 1.442695, %v616_v26  ;;  %1144 = vmatmul.mubr.msk.f32.vlgmr.msra.gmra.mrb[2].mxu0 %vm452_vm2, %v620_v27  ;;  %v879_v57 = vmul.f32 %v1098_v55, %v871_v53  ;;  %v1086_v27 = vld [vmem:[%s1847_s19 + $0x38] sm:$0xff]  ;;  %v1093_v55 = vld [vmem:[%s1847_s19 + $0x70] sm:$0xff] }
 0x272   : > { %1284 = vpow2.f32 %v617_v28  ;;  %v880_v58 = vsel %vm452_vm2, %v879_v57, 0.0 }
 0x27c   : > { %v1285_v31 = vpop.eup %1284 }
 0x27d   : > { %764 = vrot.lane.b32.xlu1 %v1285_v31, %s1521_s22  ;;  %625 = vrot.lane.b32.xlu0 %v1285_v31, %s1522_s21  ;;  %v619_v32 = vmul.f32 %v1285_v31, %v1285_v31 }
 0x281   : > { %852 = vrot.lane.b32.xlu1 %v619_v32, %s1521_s22  ;;  %846 = vrot.lane.b32.xlu0 %v619_v32, %s1522_s21 }
 0x2e0   : > { %v1882_v33 = vpop.permute.xlu0 %859  ;;  %v866_v49 = vpop.permute.xlu1 %865 }
 0x2e1   : > { %v868_v59 = vsel %vm542_vm3, %v866_v49, 0.0  ;;  %v862_v0 = vsel %vm452_vm2, %v1882_v33, 0.0 }
 0x2ef   : > { %v626_v34 = vpop.permute.xlu0 %625  ;;  %v1884_v51 = vpop.permute.xlu1 %764 }
 0x2f0   : > { %v628_v35 = vmul.f32 %v626_v34, %v441_v9 }
 0x2f2   : > { %639 = vperm.xlu1 %1268, %v628_v35   ;;  %632 = vperm.xlu0 %1267, %v628_v35  }
 0x2f3   : > { %v853_v54 = vpop.permute.xlu1 %852  ;;  %v847_v61 = vpop.permute.xlu0 %846 }
 0x2f4   : > { %v855_v56 = vsel %vm542_vm3, %v853_v54, 0.0  ;;  %v849_v63 = vsel %vm452_vm2, %v847_v61, 0.0  ;;  %v1094_v61 = vld [vmem:[%s1847_s19 + $0x78] sm:$0xff] }
 0x2f6   : > { %1269 = vset.pattern.permute.xlu1 %v1525_v36  ;;  %1271 = vset.pattern.permute.xlu0 %v1526_v37 }
 0x2f7   : > { %647 = vperm.xlu1 %1269, %v628_v35   ;;  %663 = vperm.xlu0 %1271, %v628_v35  }
 0x2fb   : > { %1270 = vset.pattern.permute.xlu1 %v1527_v38  ;;  %1274 = vset.pattern.permute.xlu0 %v1528_v39  ;;  %v1089_v39 = vld [vmem:[%s1847_s19 + $0x50] sm:$0xff] }
 0x2fc   : > { %655 = vperm.xlu1 %1270, %v628_v35   ;;  %687 = vperm.xlu0 %1274, %v628_v35  }
 0x300   : > { %1272 = vset.pattern.permute.xlu1 %v1529_v40  ;;  %1277 = vset.pattern.permute.xlu0 %v1530_v41 }
 0x301   : > { %671 = vperm.xlu1 %1272, %v628_v35   ;;  %711 = vperm.xlu0 %1277, %v628_v35  }
 0x305   : > { %1273 = vset.pattern.permute.xlu1 %v1531_v42  ;;  %1280 = vset.pattern.permute.xlu0 %v1532_v43  ;;  %v1090_v42 = vld [vmem:[%s1847_s19 + $0x58] sm:$0xff] }
 0x306   : > { %679 = vperm.xlu1 %1273, %v628_v35   ;;  %735 = vperm.xlu0 %1280, %v628_v35  }
 0x30a   : > { %1275 = vset.pattern.permute.xlu1 %v1533_v44  ;;  %1283 = vset.pattern.permute.xlu0 %v1534_v45 }
 0x30b   : > { %695 = vperm.xlu1 %1275, %v628_v35   ;;  %759 = vperm.xlu0 %1283, %v628_v35  }
 0x30f   : > { %1276 = vset.pattern.permute.xlu1 %v1535_v46 }
 0x310   : > { %703 = vperm.xlu1 %1276, %v628_v35  }
 0x314   : > { %1278 = vset.pattern.permute.xlu1 %v1536_v47  ;;  %v1091_v47 = vld [vmem:[%s1847_s19 + $0x60] sm:$0xff] }
 0x315   : > { %719 = vperm.xlu1 %1278, %v628_v35  }
 0x319   : > { %1279 = vset.pattern.permute.xlu1 %v1537_v48 }
 0x31a   : > { %727 = vperm.xlu1 %1279, %v628_v35  }
 0x31e   : > { %1281 = vset.pattern.permute.xlu1 %v1538_v50 }
 0x31f   : > { %743 = vperm.xlu1 %1281, %v628_v35  }
 0x323   : > { %1282 = vset.pattern.permute.xlu1 %v1539_v52  ;;  %v1092_v52 = vld [vmem:[%s1847_s19 + $0x68] sm:$0xff] }
 0x324   : > { %751 = vperm.xlu1 %1282, %v628_v35   ;;  %v1088_v35 = vld [vmem:[%s1847_s19 + $0x48] sm:$0xff] }
 0x32a   : > { %856 = vadd.xlane.f32.xlu0 %v855_v56 }
 0x32e   : > { %881 = vadd.xlane.f32.xlu0 %v880_v58 }
 0x332   : > { %869 = vadd.xlane.f32.xlu0 %v868_v59 }
 0x343   : > { %v1894_v60 = vpop.f32.mrb[2].mxu0 }
 0x344   : > { %v1145_v62 = vpop.f32.mrb[3].mxu0 }
 0x345   : > { %v1095_v62 = vld [vmem:[%s1847_s19 + $0x80] sm:$0xff]  ;;  %s1430_s19 = scalar_lea.vmem %s1926_s30, 128 }
 0x346   : > { %p1431_p2 = scmp.ne.s32.totalorder %s1926_s30, %s1430_s19  ;;  %p1438_p6 = scmp.lt.s32.totalorder %s1436_s4, %s1430_s19 }
 0x348   : > { %850 = vadd.xlane.f32.xlu1 %v849_v63  ;;  %p1432_p4 = pnand %p1431_p2, %p1745_p5  ;;  %p1439_p10 = por %p1438_p6, %p1437_p8 }
 0x34a   : > { %p1433_p0 = pneg %p1432_p4 }
 0x34c   : > { %863 = vadd.xlane.f32.xlu1 %v862_v0  ;;  %p1440_p3 = pnand %p1439_p10, %p1433_p0 }
 0x371   : > { %v640_v1 = vpop.permute.xlu1 %639  ;;  %v633_v4 = vpop.permute.xlu0 %632 }
 0x372   : > { %v642_v6 = vmul.f32 %v1080_v2, %v640_v1  ;;  %v635_v7 = vmul.f32 %v633_v4, %v629_v3 }
 0x374   : > { %v643_v11 = vadd.f32 %v642_v6, %v635_v7 }
 0x376   : > { %v648_v8 = vpop.permute.xlu1 %647  ;;  %v664_v16 = vpop.permute.xlu0 %663 }
 0x377   : > { %v650_v9 = vmul.f32 %v1081_v5, %v648_v8  ;;  %v666_v19 = vmul.f32 %v1083_v15, %v664_v16 }
 0x379   : > { %v651_v13 = vadd.f32 %v650_v9, %v643_v11 }
 0x37b   : > { %v656_v12 = vpop.permute.xlu1 %655  ;;  %v688_v28 = vpop.permute.xlu0 %687 }
 0x37c   : > { %v658_v14 = vmul.f32 %v1082_v10, %v656_v12  ;;  %v690_v31 = vmul.f32 %v1086_v27, %v688_v28 }
 0x37e   : > { %v659_v17 = vadd.f32 %v658_v14, %v651_v13 }
 0x380   : > { %v672_v20 = vpop.permute.xlu1 %671  ;;  %v667_v21 = vadd.f32 %v666_v19, %v659_v17  ;;  %v712_v40 = vpop.permute.xlu0 %711 }
 0x381   : > { %v674_v22 = vmul.f32 %v1084_v18, %v672_v20  ;;  %v714_v43 = vmul.f32 %v1089_v39, %v712_v40 }
 0x383   : > { %v675_v25 = vadd.f32 %v674_v22, %v667_v21 }
 0x385   : > { %v680_v24 = vpop.permute.xlu1 %679  ;;  %v736_v53 = vpop.permute.xlu0 %735 }
 0x386   : > { %v682_v26 = vmul.f32 %v1085_v23, %v680_v24  ;;  %v738_v56 = vmul.f32 %v1092_v52, %v736_v53 }
 0x388   : > { %v683_v29 = vadd.f32 %v682_v26, %v675_v25 }
 0x38a   : > { %v696_v32 = vpop.permute.xlu1 %695  ;;  %v691_v33 = vadd.f32 %v690_v31, %v683_v29  ;;  %v760_v63 = vpop.permute.xlu0 %759 }
 0x38b   : > { %v698_v34 = vmul.f32 %v1087_v30, %v696_v32  ;;  %v762_v3 = vmul.f32 %v1095_v62, %v760_v63 }
 0x38d   : > { %v699_v37 = vadd.f32 %v698_v34, %v691_v33 }
 0x38f   : > { %v704_v36 = vpop.permute.xlu1 %703 }
 0x390   : > { %v706_v38 = vmul.f32 %v1088_v35, %v704_v36 }
 0x392   : > { %v707_v41 = vadd.f32 %v706_v38, %v699_v37 }
 0x394   : > { %v720_v44 = vpop.permute.xlu1 %719  ;;  %v715_v45 = vadd.f32 %v714_v43, %v707_v41 }
 0x395   : > { %v722_v46 = vmul.f32 %v1090_v42, %v720_v44 }
 0x397   : > { %v723_v49 = vadd.f32 %v722_v46, %v715_v45 }
 0x399   : > { %v728_v48 = vpop.permute.xlu1 %727 }
 0x39a   : > { %v730_v50 = vmul.f32 %v1091_v47, %v728_v48 }
 0x39c   : > { %v731_v54 = vadd.f32 %v730_v50, %v723_v49 }
 0x39e   : > { %v744_v57 = vpop.permute.xlu1 %743  ;;  %v739_v58 = vadd.f32 %v738_v56, %v731_v54 }
 0x39f   : > { %v746_v59 = vmul.f32 %v1093_v55, %v744_v57 }
 0x3a1   : > { %v747_v1 = vadd.f32 %v746_v59, %v739_v58 }
 0x3a3   : > { %v752_v0 = vpop.permute.xlu1 %751 }
 0x3a4   : > { %v754_v2 = vmul.f32 %v1094_v61, %v752_v0 }
 0x3a6   : > { %v755_v4 = vadd.f32 %v754_v2, %v747_v1 }
 0x3a8   : > { %v763_v5 = vadd.f32 %v762_v3, %v755_v4 }
 0x3aa   : > { %v767_v6 = vmul.f32 %v1884_v51, %v763_v5 }
 0x3ac   : > { %v841_v7 = vadd.f32 %v1894_v60, %v767_v6 }
 0x3ae   : > { %844 = vst.msk [vmem:[%s430_s20] sm:$0xff] %vm542_vm3, %v841_v7 }
 0x3af   : > { %1443 = shalt.err (!%p1440_p3)
}
 0x3b0   : > { %s1444_s25 = scalar_lea.hbm %s1924_s18, 128  ;;  %s1448_s22 = scalar_lea.hbm %s1982_s8, 256 }
 0x3b1   : > { %p1445_p9 = scmp.ne.s32.totalorder %s1924_s18, %s1444_s25  ;;  %p1449_p7 = scmp.lt.u32.totalorder %s1924_s18, %s1982_s8 }
 0x3b2   : > { %p1450_p12 = scmp.lt.u32.totalorder %s1448_s22, %s1444_s25  ;;  %p1452_p2 = scmp.lt.u32.totalorder %s1444_s25, %s1924_s18 }
 0x3b3   : > { %p1446_p13 = pnand %p1445_p9, %p1745_p5 }
 0x3b4   : > { %p1451_p1 = por %p1450_p12, %p1449_p7 }
 0x3b5   : > { %p1447_p11 = pneg %p1446_p13 }
 0x3b6   : > { %p1453_p4 = por %p1452_p2, %p1451_p1 }
 0x3b8   : > { %p1454_p0 = pnand %p1453_p4, %p1447_p11 }
 0x3ba   : > { %1457 = shalt.err (!%p1454_p0)
}
 0x3bb   : > { %1176 = dma.vmem_to_hbm [thread:$0]  (%p1745_p5), %s1926_s30, 128, %s1924_s18, %s894_s29   ;;  %v857_v51 = vpop.xlane.xlu0 %856  ;;  %vm891_vm4 = vcmask 7168  }
 0x3bc   : > { %p437_p8 = scmp.lt.s32.totalorder %s1612_s13, 1  ;;  %s2017_s20 = sld [smem:[#allocation22_spill]] }
 0x3be   : > { %s2027_s13 = smov (!%p437_p8, %s1612_s13), 1 }
 0x3bf   : > { %v882_v60 = vpop.xlane.xlu0 %881  ;;  %s1074_s2 = sshll.u32 %s2027_s13, 3 }
 0x3c2   : > { %s440_s9 = scalar_lea.vmem %s2017_s20, %s1074_s2 }
 0x3c3   : > { %v870_v11 = vpop.xlane.xlu0 %869 }
 0x3c4   : > { %v888_v15 = vmul.f32 17.0, %v870_v11 }
 0x3d5   : > { %v851_v8 = vpop.xlane.xlu1 %850 }
 0x3d6   : > { %v883_v9 = vmul.f32 %v857_v51, %v851_v8 }
 0x3d8   : > { %v884_v10 = vadd.f32 %v883_v9, %v882_v60 }
 0x3d9   : > { %v864_v12 = vpop.xlane.xlu1 %863 }
 0x3da   : > { %v1099_v13 = vadd.f32 -544.0, %v884_v10  ;;  %v886_v14 = vmul.f32 32.0, %v864_v12 }
 0x3dc   : > { %v887_v16 = vsub.f32 %v1099_v13, %v886_v14 }
 0x3de   : > { %v889_v17 = vsub.f32 %v887_v16, %v888_v15 }
 0x3e0   : > { %v890_v18 = vmul.f32 0.5, %v889_v17 }
 0x3e2   : > { %892 = vst.msk [vmem:[%s440_s9] sm:$0xff] %vm891_vm4, %v890_v18 }
 0x3e3 PF: > { %s2018_s30 = sld [smem:[#allocation17_spill]]  ;;  %s2019_s17 = sld [smem:[#allocation18_spill]] }
 0x3e4   : > { %p2021_p6 = scmp.ge.s32.totalorder %s1508_s12, 2 }
 0x3e9   : > { %s926_s18 = sand.u32 1, %s2018_s30   ;;  %p2020_p5 = scmp.ne.s32.totalorder %s2019_s17, 0 }
 0x3ea   : > { %s927_s29 = scalar_lea.sflag [#allocation4], %s926_s18 }
 0x3eb   : > { %p1196_p10 = pnand %p2021_p6, %p2020_p5 }
 0x3ed   : > { %1491 = dma.done.wait (!%p1196_p10), %s927_s29, 128  }
 0x3ee   : > { %1493 = vsyncadd (!%p1196_p10), %s927_s29, 4294967168  ;;  %p27_p3 = scmp.ge.s32.totalorder %s1731_s14, 4   ;;  %s2022_s30 = smov %s1500_s10 }
 0x3ef   : > { %s2023_s10 = smov %s1504_s11  ;;  %s2024_s11 = smov %s1741_s16 }
 0x3f0   : > { %s2025_s12 = smov %s1731_s14  ;;  %29 = sbr.rel (!%p27_p3) target bundleno = 13 (0xd), region = 150 }
 0x3f7   :  { %939 = vsyncpa [#allocation3], 1 }
 0x3f8   :  { %941 = vsyncpa [#allocation3 + $0x1], 1 }
 0x3f9   :  { %942 = vsyncpa [#allocation6], 1 }
 0x3fa   :  { %944 = vsyncpa [#allocation6 + $0x1], 1 }
 0x3fb   :  { %945 = vsyncpa [#allocation9], 1 }
 0x3fc   :  { %946 = vsyncpa [#allocation4], 1 }
 0x3fd   :  { %948 = vsyncpa [#allocation4 + $0x1], 1 }

</bundles_post_ra>
